<compile_context>
chip_gen: v7x
topology: tpu7x:2x2x1
jax: 0.10.0
libtpu: 0.0.40
codegen_flags: <defaults>
</compile_context>

<pallas_src>
import math

import jax
import jax.numpy as jnp
from jax.experimental import pallas as pl
from jax.experimental.pallas import tpu as pltpu

NEG_SLOPE_ATT = 0.2   # LeakyReLU inside GATConv attention
NEG_SLOPE_ACT = 0.01  # nn.LeakyReLU() between layers
LANE = 128
MASK_NEG = 1e30


def _leaky_relu(x, slope):
    # For 0 < slope < 1 this equals where(x > 0, x, slope*x): mul + max (2 ops).
    return jnp.maximum(x, slope * x)


def _round_up(v, m):
    return ((v + m - 1) // m) * m


def _pad2d(a, rows, cols):
    return jnp.pad(a, ((0, rows - a.shape[0]), (0, cols - a.shape[1])))


def gat_fused_kernel(x_ref, w_ref, asrc_ref, adst_ref, bias_ref, maskb_ref,
                     out_ref, h_scratch):
    """One grid step == one GAT layer; activation carried in h_scratch (VMEM, bf16).

    x_ref:     (N, P)  bf16 padded input features (read on layer 0 only)
    w_ref:     (1, P, P) bf16 this layer's padded weight
    asrc/adst/bias_ref: (1, 1, P) f32 padded attention vectors / bias
    maskb_ref: (N, N)  f32 additive mask bias: 0 for edges (src->dst), -1e30 otherwise
    out_ref:   (N, P)  f32  final layer output (written on last step only)
    h_scratch: (N, P)  bf16 inter-layer activation carry
    """
    l = pl.program_id(0)
    nl = pl.num_programs(0)

    @pl.when(l == 0)
    def _():
        h_scratch[...] = x_ref[...]

    xin = h_scratch[...]                                 # (N, P) bf16
    w = w_ref[0]                                         # (P, P) bf16

    # Linear transform: bf16 operands on the MXU, f32 accumulation.
    h = jnp.dot(xin, w, preferred_element_type=jnp.float32)      # (N, P) f32

    # Per-node attention logits: VPU multiply + lane reduce (no (N,P) transpose).
    a_dst = jnp.sum(h * adst_ref[0], axis=-1, keepdims=True)     # (N, 1) f32
    a_src = jnp.sum(h * asrc_ref[0], axis=-1, keepdims=True)     # (N, 1) f32

    # Edge logits e[i, j] = a_dst[i] + a_src[j]; LeakyReLU(0.2); additive mask
    # bias (-1e30 on non-edges).  Self loops guarantee a non-empty row, so the
    # exp of masked entries underflowing to 0 never yields a 0 denominator.
    e = _leaky_relu(a_dst + a_src.T, NEG_SLOPE_ATT) + maskb_ref[...]   # (N, N)
    m = jnp.max(e, axis=-1, keepdims=True)
    p = jnp.exp(e - m)                                   # masked entries -> exactly 0
    denom = jnp.sum(p, axis=-1, keepdims=True)
    inv_denom = pl.reciprocal(denom, approx=True)        # EUP slot, off MXU path

    # Aggregate neighbors with UNNORMALIZED p (bf16 on the MXU, f32 acc), then
    # normalize the (N, P) result row-wise and add bias.
    agg = jnp.dot(p.astype(jnp.bfloat16), h.astype(jnp.bfloat16),
                  preferred_element_type=jnp.float32)    # (N, P) f32
    out = agg * inv_denom + bias_ref[0]

    # Inter-layer nn.LeakyReLU feeds the next grid step; last layer goes out raw.
    @pl.when(l != nl - 1)
    def _():
        h_scratch[...] = _leaky_relu(out, NEG_SLOPE_ACT).astype(jnp.bfloat16)

    @pl.when(l == nl - 1)
    def _():
        out_ref[...] = out


def pack_gat_params(params, p):
    """Stack per-layer params, zero-padded to lane-dense shapes; W stored bf16."""
    w_all = jnp.stack([_pad2d(w, p, p) for (w, _, _, _) in params]).astype(jnp.bfloat16)
    asrc_all = jnp.stack([_pad2d(a, 1, p) for (_, a, _, _) in params])
    adst_all = jnp.stack([_pad2d(a, 1, p) for (_, _, a, _) in params])
    bias_all = jnp.stack([_pad2d(b, 1, p) for (_, _, _, b) in params])
    return w_all, asrc_all, adst_all, bias_all


def gat_forward(params, x, adj_i8):
    """Fused multi-layer GAT forward. x: (N, F_in) f32, adj_i8: (N, N) int8 mask."""
    n, f_in = x.shape
    hidden = params[0][0].shape[1]
    num_layers = len(params)
    p = _round_up(max(f_in, hidden), LANE)   # lane-dense feature dim

    x_pad = _pad2d(x, n, p).astype(jnp.bfloat16)
    w_all, asrc_all, adst_all, bias_all = pack_gat_params(params, p)
    # Additive mask bias: 0 where edge src->dst exists, -1e30 otherwise.
    mask_bias = (adj_i8.astype(jnp.float32) - 1.0) * MASK_NEG

    out_pad = pl.pallas_call(
        gat_fused_kernel,
        out_shape=jax.ShapeDtypeStruct((n, p), jnp.float32),
        grid_spec=pltpu.PrefetchScalarGridSpec(
            num_scalar_prefetch=0,
            grid=(num_layers,),
            in_specs=[
                pl.BlockSpec((n, p), lambda l: (0, 0)),        # x (bf16, layer-0 input)
                pl.BlockSpec((1, p, p), lambda l: (l, 0, 0)),  # W_l   (bf16)
                pl.BlockSpec((1, 1, p), lambda l: (l, 0, 0)),  # att_src_l
                pl.BlockSpec((1, 1, p), lambda l: (l, 0, 0)),  # att_dst_l
                pl.BlockSpec((1, 1, p), lambda l: (l, 0, 0)),  # bias_l
                pl.BlockSpec((n, n), lambda l: (0, 0)),        # mask bias (f32, resident)
            ],
            out_specs=pl.BlockSpec((n, p), lambda l: (0, 0)),
            scratch_shapes=[pltpu.VMEM((n, p), jnp.bfloat16)],  # activation carry
        ),
        compiler_params=pltpu.CompilerParams(
            dimension_semantics=("arbitrary",),   # layer axis carries state
            vmem_limit_bytes=32 * 1024 * 1024,
        ),
    )(x_pad, w_all, asrc_all, adst_all, bias_all, mask_bias)
    return out_pad[:, :hidden]


def init_gat_params(key, num_layers, input_dim, hidden_dim):
    """Deterministic glorot-uniform init matching GATConv parameter shapes."""
    params = []
    dims = [input_dim] + [hidden_dim] * num_layers
    for i in range(num_layers):
        key, k1, k2, k3 = jax.random.split(key, 4)
        fan_in, fan_out = dims[i], dims[i + 1]
        lim_w = math.sqrt(6.0 / (fan_in + fan_out))
        w = jax.random.uniform(k1, (fan_in, fan_out), jnp.float32, -lim_w, lim_w)
        lim_a = math.sqrt(6.0 / (1 + fan_out))
        att_src = jax.random.uniform(k2, (1, fan_out), jnp.float32, -lim_a, lim_a)
        att_dst = jax.random.uniform(k3, (1, fan_out), jnp.float32, -lim_a, lim_a)
        bias = jnp.zeros((1, fan_out), jnp.float32)
        params.append((w, att_src, att_dst, bias))
    return params


def edge_index_to_dense_adj(edge_index, num_nodes):
    """adj[dst, src] = 1 (int8) per edge src->dst; self loops added (add_self_loops=True)."""
    src, dst = edge_index[0], edge_index[1]
    adj = jnp.zeros((num_nodes, num_nodes), jnp.int8)
    adj = adj.at[dst, src].set(1)
    idx = jnp.arange(num_nodes)
    adj = adj.at[idx, idx].set(1)
    return adj


def gat_reference(params, x, adj_i8):
    """Pure-JAX reference with matching (bf16-matmul, f32-acc) numerics."""
    mask = adj_i8 != 0
    num_layers = len(params)
    x = x.astype(jnp.bfloat16)
    for i, (w, a_s, a_d, b) in enumerate(params):
        h = jnp.dot(x, w.astype(jnp.bfloat16), preferred_element_type=jnp.float32)
        a_dst = jnp.sum(h * a_d, axis=-1, keepdims=True)
        a_src = jnp.sum(h * a_s, axis=-1, keepdims=True)
        e = _leaky_relu(a_dst + a_src.T, NEG_SLOPE_ATT)
        e = jnp.where(mask, e, -MASK_NEG)
        m = jnp.max(e, axis=-1, keepdims=True)
        p = jnp.where(mask, jnp.exp(e - m), 0.0)
        alpha = p / jnp.sum(p, axis=-1, keepdims=True)
        out = jnp.dot(alpha.astype(jnp.bfloat16), h.astype(jnp.bfloat16),
                      preferred_element_type=jnp.float32) + b
        if i != num_layers - 1:
            x = _leaky_relu(out, NEG_SLOPE_ACT).astype(jnp.bfloat16)
        else:
            x = out
    return x


if __name__ == "__main__":
    N, F_IN, HIDDEN, NUM_LAYERS, NUM_EDGES = 64, 16, 32, 2, 256

    key = jax.random.PRNGKey(0)
    kx, ks, kd = jax.random.split(key, 3)
    x = jax.random.normal(kx, (N, F_IN), jnp.float32)
    src = jax.random.randint(ks, (NUM_EDGES,), 0, N)
    dst = jax.random.randint(kd, (NUM_EDGES,), 0, N)
    edge_index = jnp.stack([src, dst], axis=0)              # (2, E) like data.edge_index
    adj = edge_index_to_dense_adj(edge_index, N)            # (N, N) int8

    params = init_gat_params(jax.random.PRNGKey(42), NUM_LAYERS, F_IN, HIDDEN)

    out = gat_forward(params, x, adj)
    jax.block_until_ready(out)
    assert out.shape == (N, HIDDEN) and out.dtype == jnp.float32

    ref = gat_reference(params, x, adj)
    err = float(jnp.max(jnp.abs(out - ref)))
    tol = 5e-2 * (1.0 + float(jnp.max(jnp.abs(ref))))
    assert err <= tol, f"max abs err {err} > tol {tol}"
    print("KERNEL_OK")
</pallas_src>

<mosaic_0001>
module attributes {stable_mosaic.version = 11 : i64} {
  func.func @gat_fused_kernel(%arg0: i32, %arg1: memref<64x128xbf16, #tpu.memory_space<vmem>>, %arg2: memref<1x128x128xbf16, #tpu.memory_space<vmem>>, %arg3: memref<1x1x128xf32, #tpu.memory_space<vmem>>, %arg4: memref<1x1x128xf32, #tpu.memory_space<vmem>>, %arg5: memref<1x1x128xf32, #tpu.memory_space<vmem>>, %arg6: memref<64x64xf32, #tpu.memory_space<vmem>>, %arg7: memref<64x128xf32, #tpu.memory_space<vmem>>, %arg8: memref<64x128xbf16, #tpu.memory_space<vmem>>) attributes {dimension_semantics = [#tpu.dimension_semantics<arbitrary>], iteration_bounds = array<i64: 2>, scalar_prefetch = 0 : i64, scratch_operands = 1 : i64, tpu.core_type = #tpu.core_type<tc>, window_params = [{pipeline_mode = #tpu.pipeline_mode<synchronous>, transform_indices = @transform_0, window_bounds = array<i64: 64, 128>}, {transform_indices = @transform_1, window_bounds = array<i64: 1, 128, 128>}, {transform_indices = @transform_2, window_bounds = array<i64: 1, 1, 128>}, {transform_indices = @transform_3, window_bounds = array<i64: 1, 1, 128>}, {transform_indices = @transform_4, window_bounds = array<i64: 1, 1, 128>}, {pipeline_mode = #tpu.pipeline_mode<synchronous>, transform_indices = @transform_5, window_bounds = array<i64: 64, 64>}, {pipeline_mode = #tpu.pipeline_mode<synchronous>, transform_indices = @transform_6, window_bounds = array<i64: 64, 128>}]} {
    %c0_i32 = arith.constant 0 : i32
    %0 = arith.cmpi eq, %arg0, %c0_i32 : i32
    %1 = arith.extui %0 : i1 to i32
    %c0_i32_0 = arith.constant 0 : i32
    %2 = arith.cmpi ne, %1, %c0_i32_0 : i32
    scf.if %2 {
      %c0_25 = arith.constant 0 : index
      %c0_26 = arith.constant 0 : index
      %51 = vector.load %arg1[%c0_25, %c0_26] : memref<64x128xbf16, #tpu.memory_space<vmem>>, vector<64x128xbf16>
      %c0_27 = arith.constant 0 : index
      %c0_28 = arith.constant 0 : index
      %52 = vector.load %arg8[%c0_27, %c0_28] : memref<64x128xbf16, #tpu.memory_space<vmem>>, vector<64x128xbf16>
      tpu.vector_store %arg8[%c0_27, %c0_28], %51 {strides = array<i32>} : memref<64x128xbf16, #tpu.memory_space<vmem>>, vector<64x128xbf16>,
    } else {
    }
    %c0 = arith.constant 0 : index
    %c0_1 = arith.constant 0 : index
    %3 = vector.load %arg8[%c0, %c0_1] : memref<64x128xbf16, #tpu.memory_space<vmem>>, vector<64x128xbf16>
    %c0_2 = arith.constant 0 : index
    %c0_3 = arith.constant 0 : index
    %c0_4 = arith.constant 0 : index
    %4 = vector.load %arg2[%c0_2, %c0_3, %c0_4] : memref<1x128x128xbf16, #tpu.memory_space<vmem>>, vector<1x128x128xbf16>
    %5 = vector.shape_cast %4 : vector<1x128x128xbf16> to vector<128x128xbf16>
    %cst = arith.constant dense<0.000000e+00> : vector<64x128xf32>
    %6 = tpu.matmul %3, %5, %cst {dimension_numbers = #tpu.dot_dimension_numbers<[1], [0], [0], [1], [0, 0, 1, 1], [], []>} : vector<64x128xbf16>, vector<128x128xbf16>, vector<64x128xf32> -> vector<64x128xf32>
    %c0_5 = arith.constant 0 : index
    %c0_6 = arith.constant 0 : index
    %c0_7 = arith.constant 0 : index
    %7 = vector.load %arg4[%c0_5, %c0_6, %c0_7] : memref<1x1x128xf32, #tpu.memory_space<vmem>>, vector<1x1x128xf32>
    %8 = vector.shape_cast %7 : vector<1x1x128xf32> to vector<1x128xf32>
    %9 = vector.broadcast %8 : vector<1x128xf32> to vector<64x128xf32>
    %10 = arith.mulf %6, %9 : vector<64x128xf32>
    %cst_8 = arith.constant dense<0.000000e+00> : vector<64xf32>
    %11 = vector.multi_reduction <add>, %10, %cst_8 [1] : vector<64x128xf32> to vector<64xf32>
    %12 = vector.shape_cast %11 : vector<64xf32> to vector<64x1xf32>
    %c0_9 = arith.constant 0 : index
    %c0_10 = arith.constant 0 : index
    %c0_11 = arith.constant 0 : index
    %13 = vector.load %arg3[%c0_9, %c0_10, %c0_11] : memref<1x1x128xf32, #tpu.memory_space<vmem>>, vector<1x1x128xf32>
    %14 = vector.shape_cast %13 : vector<1x1x128xf32> to vector<1x128xf32>
    %15 = vector.broadcast %14 : vector<1x128xf32> to vector<64x128xf32>
    %16 = arith.mulf %6, %15 : vector<64x128xf32>
    %cst_12 = arith.constant dense<0.000000e+00> : vector<64xf32>
    %17 = vector.multi_reduction <add>, %16, %cst_12 [1] : vector<64x128xf32> to vector<64xf32>
    %18 = vector.shape_cast %17 : vector<64xf32> to vector<64x1xf32>
    %19 = tpu.transpose %18, [1, 0] : vector<64x1xf32> -> vector<1x64xf32>
    %20 = vector.broadcast %12 : vector<64x1xf32> to vector<64x64xf32>
    %21 = vector.broadcast %19 : vector<1x64xf32> to vector<64x64xf32>
    %22 = arith.addf %20, %21 : vector<64x64xf32>
    %cst_13 = arith.constant 2.000000e-01 : f32
    %23 = vector.broadcast %cst_13 : f32 to vector<64x64xf32>
    %24 = arith.mulf %23, %22 : vector<64x64xf32>
    %25 = arith.maximumf %22, %24 : vector<64x64xf32>
    %c0_14 = arith.constant 0 : index
    %c0_15 = arith.constant 0 : index
    %26 = vector.load %arg6[%c0_14, %c0_15] : memref<64x64xf32, #tpu.memory_space<vmem>>, vector<64x64xf32>
    %27 = arith.addf %25, %26 : vector<64x64xf32>
    %cst_16 = arith.constant dense<0xFF800000> : vector<64xf32>
    %28 = vector.multi_reduction <maximumf>, %27, %cst_16 [1] : vector<64x64xf32> to vector<64xf32>
    %29 = vector.shape_cast %28 : vector<64xf32> to vector<64x1xf32>
    %30 = vector.broadcast %29 : vector<64x1xf32> to vector<64x64xf32>
    %31 = arith.subf %27, %30 : vector<64x64xf32>
    %32 = math.exp %31 : vector<64x64xf32>
    %cst_17 = arith.constant dense<0.000000e+00> : vector<64xf32>
    %33 = vector.multi_reduction <add>, %32, %cst_17 [1] : vector<64x64xf32> to vector<64xf32>
    %34 = vector.shape_cast %33 : vector<64xf32> to vector<64x1xf32>
    %35 = tpu.reciprocal %34 {approx = true} : vector<64x1xf32> -> vector<64x1xf32>
    %36 = arith.truncf %32 : vector<64x64xf32> to vector<64x64xbf16>
    %37 = arith.truncf %6 : vector<64x128xf32> to vector<64x128xbf16>
    %cst_18 = arith.constant dense<0.000000e+00> : vector<64x128xf32>
    %38 = tpu.matmul %36, %37, %cst_18 {dimension_numbers = #tpu.dot_dimension_numbers<[1], [0], [0], [1], [0, 0, 1, 1], [], []>} : vector<64x64xbf16>, vector<64x128xbf16>, vector<64x128xf32> -> vector<64x128xf32>
    %39 = vector.broadcast %35 : vector<64x1xf32> to vector<64x128xf32>
    %40 = arith.mulf %38, %39 : vector<64x128xf32>
    %c0_19 = arith.constant 0 : index
    %c0_20 = arith.constant 0 : index
    %c0_21 = arith.constant 0 : index
    %41 = vector.load %arg5[%c0_19, %c0_20, %c0_21] : memref<1x1x128xf32, #tpu.memory_space<vmem>>, vector<1x1x128xf32>
    %42 = vector.shape_cast %41 : vector<1x1x128xf32> to vector<1x128xf32>
    %43 = vector.broadcast %42 : vector<1x128xf32> to vector<64x128xf32>
    %44 = arith.addf %40, %43 : vector<64x128xf32>
    %c1_i32 = arith.constant 1 : i32
    %45 = arith.cmpi ne, %arg0, %c1_i32 : i32
    %46 = arith.extui %45 : i1 to i32
    %c0_i32_22 = arith.constant 0 : i32
    %47 = arith.cmpi ne, %46, %c0_i32_22 : i32
    scf.if %47 {
      %cst_25 = arith.constant 0.00999999977 : f32
      %51 = vector.broadcast %cst_25 : f32 to vector<64x128xf32>
      %52 = arith.mulf %51, %44 : vector<64x128xf32>
      %53 = arith.maximumf %44, %52 : vector<64x128xf32>
      %54 = arith.truncf %53 : vector<64x128xf32> to vector<64x128xbf16>
      %c0_26 = arith.constant 0 : index
      %c0_27 = arith.constant 0 : index
      %55 = vector.load %arg8[%c0_26, %c0_27] : memref<64x128xbf16, #tpu.memory_space<vmem>>, vector<64x128xbf16>
      tpu.vector_store %arg8[%c0_26, %c0_27], %54 {strides = array<i32>} : memref<64x128xbf16, #tpu.memory_space<vmem>>, vector<64x128xbf16>,
    } else {
    }
    %c1_i32_23 = arith.constant 1 : i32
    %48 = arith.cmpi eq, %arg0, %c1_i32_23 : i32
    %49 = arith.extui %48 : i1 to i32
    %c0_i32_24 = arith.constant 0 : i32
    %50 = arith.cmpi ne, %49, %c0_i32_24 : i32
    scf.if %50 {
      %c0_25 = arith.constant 0 : index
      %c0_26 = arith.constant 0 : index
      %51 = vector.load %arg7[%c0_25, %c0_26] : memref<64x128xf32, #tpu.memory_space<vmem>>, vector<64x128xf32>
      tpu.vector_store %arg7[%c0_25, %c0_26], %44 {strides = array<i32>} : memref<64x128xf32, #tpu.memory_space<vmem>>, vector<64x128xf32>,
    } else {
    }
    return
  }
  func.func @transform_0(%arg0: i32) -> (i32, i32) {
    %c0_i32 = arith.constant 0 : i32
    %c0_i32_0 = arith.constant 0 : i32
    %c0_i32_1 = arith.constant 0 : i32
    return %c0_i32, %c0_i32_0 : i32, i32
  }
  func.func @transform_1(%arg0: i32) -> (i32, i32, i32) {
    %c0_i32 = arith.constant 0 : i32
    %c0_i32_0 = arith.constant 0 : i32
    %c0_i32_1 = arith.constant 0 : i32
    return %arg0, %c0_i32, %c0_i32_0 : i32, i32, i32
  }
  func.func @transform_2(%arg0: i32) -> (i32, i32, i32) {
    %c0_i32 = arith.constant 0 : i32
    %c0_i32_0 = arith.constant 0 : i32
    %c0_i32_1 = arith.constant 0 : i32
    return %arg0, %c0_i32, %c0_i32_0 : i32, i32, i32
  }
  func.func @transform_3(%arg0: i32) -> (i32, i32, i32) {
    %c0_i32 = arith.constant 0 : i32
    %c0_i32_0 = arith.constant 0 : i32
    %c0_i32_1 = arith.constant 0 : i32
    return %arg0, %c0_i32, %c0_i32_0 : i32, i32, i32
  }
  func.func @transform_4(%arg0: i32) -> (i32, i32, i32) {
    %c0_i32 = arith.constant 0 : i32
    %c0_i32_0 = arith.constant 0 : i32
    %c0_i32_1 = arith.constant 0 : i32
    return %arg0, %c0_i32, %c0_i32_0 : i32, i32, i32
  }
  func.func @transform_5(%arg0: i32) -> (i32, i32) {
    %c0_i32 = arith.constant 0 : i32
    %c0_i32_0 = arith.constant 0 : i32
    %c0_i32_1 = arith.constant 0 : i32
    return %c0_i32, %c0_i32_0 : i32, i32
  }
  func.func @transform_6(%arg0: i32) -> (i32, i32) {
    %c0_i32 = arith.constant 0 : i32
    %c0_i32_0 = arith.constant 0 : i32
    %c0_i32_1 = arith.constant 0 : i32
    return %c0_i32, %c0_i32_0 : i32, i32
  }
}

</mosaic_0001>

<bundles_post_ra>
// kernel: tpu_custom_call.1
= control target key start
LH: loop header
LB: loop body
LE: loop exit
PB: predicated region body
PF: predicated region fallthrough
CT: control target
= control target key end

     0   :  { %11 = vsyncpa [#allocation4], 0  ;;  %s1670_s0 = inlined_call_operand.hbm [shape: bf16[64,128], index: 0, kind: input, shape index: {}]   ;;  %s1671_s1 = inlined_call_operand.hbm [shape: bf16[2,128,128], index: 1, kind: input, shape index: {}]   ;;  %s1672_s2 = inlined_call_operand.vmem [shape: f32[2,1,128], index: 2, kind: input, shape index: {}]   ;;  %s1673_s3 = inlined_call_operand.vmem [shape: f32[2,1,128], index: 3, kind: input, shape index: {}]   ;;  %s1674_s4 = inlined_call_operand.vmem [shape: f32[2,1,128], index: 4, kind: input, shape index: {}]   ;;  %s1675_s5 = inlined_call_operand.hbm [shape: f32[64,64], index: 5, kind: input, shape index: {}]   ;;  %s1676_s6 = inlined_call_operand.hbm [shape: f32[64,128], index: 6, kind: output, shape index: {}]  }
   0x1   :  { %12 = vsyncpa [#allocation7], 0 }
   0x2   :  { %14 = vsyncpa [#allocation7 + $0x1], 0 }
   0x3   :  { %15 = vsyncpa [#allocation5], 0  ;;  %s1399_s21 = smov 0   ;;  %s1401_s22 = smov 0  }
   0x4   :  { %s1403_s23 = smov 0   ;;  %s1405_s24 = smov 0  }
   0x5 LB: > { %s1418_s25 = sadd.s32 4294967295, %s1352_s24   ;;  %s1421_s26 = sadd.s32 1, %s1352_s24   ;;  %s1352_s24 = sphi %s1405_s24, %s1697_s24   ;;  %s1348_s23 = sphi %s1403_s23, %s1696_s23   ;;  %s1344_s22 = sphi %s1401_s22, %s1695_s22   ;;  %s1340_s21 = sphi %s1399_s21, %s1694_s21  }
   0x6   : > { %s46_s27 = ssub.s32 %s1352_s24, %s1421_s26  ;;  %s49_s28 = sadd.s32 1, %s1348_s23 }
   0x7   : > { %p47_p0 = scmp.eq.s32.totalorder %s46_s27, 0  ;;  %p56_p1 = scmp.ne.s32.totalorder %s1348_s23, %s1344_s22 }
   0x8   : > { %p57_p2 = scmp.eq.s32.totalorder %s1352_s24, 0  ;;  %p62_p3 = scmp.ne.s32.totalorder %s1344_s22, %s1340_s21 }
   0x9   : > { %s1431_s29 = scalar_select %p47_p0, %s1348_s23, %s49_s28  }
   0xa   : > { %p1433_p4 = por %p57_p2, %p56_p1  ;;  %p1677_p5 = scmp.eq.s32.totalorder %s1418_s25, 0 }
   0xb   : > { %p978_p6 = scmp.ge.s32.totalorder %s1352_s24, 1  ;;  %p193_p7 = scmp.lt.s32.totalorder %s1352_s24, 3 }
   0xc   : > { %p1442_p8 = por %p1677_p5, %p62_p3  ;;  %s1354_s9 = smov [#allocation8]  }
   0xd   : > { %p1447_p10 = pnand %p978_p6, %p193_p7  ;;  %s218_s10 = sshll.u32 %s1354_s9, 4  ;;  %s219_s10 = int_to_ptr.vmem [resolvable:$true] %s218_s10 }
   0xe   : > { %s1682_s7 = scalar_select %p1442_p8, 1, 0 }
   0xf   : > { %s1683_s8 = scalar_select %p1447_p10, 1, 0 }
  0x10   : > { %p1090_p11 = pneg %p1447_p10  ;;  %p1103_p13 = scmp.lt.s32.totalorder %s1352_s24, 2 }
  0x11   : > { %s1194_s15 = scalar_lea.hbm %s1675_s5, 1024 }
  0x12   : > { %p1455_p12 = pnand %p1090_p11, %p1677_p5  ;;  %p1462_p0 = pnand %p1103_p13, %p1433_p4 }
  0x13   : > { %p1195_p1 = scmp.ne.s32.totalorder %s1675_s5, %s1194_s15  ;;  %p1201_p4 = scmp.lt.u32.totalorder %s1194_s15, %s1675_s5 }
  0x14   : > { %s1685_s12 = scalar_select %p1462_p0, 1, 0 }
  0x15   : > { %p1196_p2 = pneg %p1455_p12 }
  0x17   : > { %p1197_p3 = pnand %p1196_p2, %p1195_p1 }
  0x19   : > { %p1198_p6 = pneg %p1197_p3 }
  0x1b   : > { %p1203_p7 = pnand %p1201_p4, %p1198_p6 }
  0x1d   : > { %1206 = shalt.err (!%p1203_p7)
}
  0x1e   : > { %s1207_s20 = scalar_lea.vmem %s219_s10, 1024  ;;  %p1215_p5 = scmp.lt.s32.totalorder %s219_s10, %s219_s10 }
  0x1f   : > { %p1208_p11 = scmp.ne.s32.totalorder %s219_s10, %s1207_s20  ;;  %p1216_p8 = scmp.lt.s32.totalorder %s1207_s20, %s1207_s20 }
  0x21   : > { %p1210_p13 = pnand %p1208_p11, %p1196_p2  ;;  %p1217_p10 = por %p1216_p8, %p1215_p5 }
  0x23   : > { %p1211_p9 = pneg %p1210_p13 }
  0x25   : > { %p1218_p0 = pnand %p1217_p10, %p1211_p9 }
  0x27   : > { %1221 = shalt.err (!%p1218_p0)
}
  0x28   : > { %s1355_s21 = smov 128   ;;  %s1356_s27 = smov 8  }
  0x29   : > { %1096 = dma.hbm_to_vmem [thread:$0]  (!%p1455_p12), %s1675_s5, 1024, %s219_s10, [#allocation7], %s1355_s21, %s1355_s21, %s1356_s27  }
  0x2a   : > { %s1357_s9 = smov [#allocation3]   ;;  %s1222_s16 = scalar_lea.hbm %s1670_s0, 512 }
  0x2b   : > { %s205_s13 = sshll.u32 %s1357_s9, 4  ;;  %p1223_p5 = scmp.ne.s32.totalorder %s1670_s0, %s1222_s16  ;;  %s206_s13 = int_to_ptr.vmem [resolvable:$true] %s205_s13 }
  0x2c   : > { %p1229_p10 = scmp.lt.u32.totalorder %s1222_s16, %s1670_s0 }
  0x2d   : > { %p1225_p8 = pnand %p1223_p5, %p1196_p2 }
  0x2f   : > { %p1226_p9 = pneg %p1225_p8 }
  0x31   : > { %p1231_p0 = pnand %p1229_p10, %p1226_p9 }
  0x33   : > { %1234 = shalt.err (!%p1231_p0)
}
  0x34   : > { %s1235_s10 = scalar_lea.vmem %s206_s13, 512  ;;  %p1243_p4 = scmp.lt.s32.totalorder %s206_s13, %s206_s13 }
  0x35   : > { %p1236_p1 = scmp.ne.s32.totalorder %s206_s13, %s1235_s10  ;;  %p1244_p7 = scmp.lt.s32.totalorder %s1235_s10, %s1235_s10 }
  0x37   : > { %p1238_p3 = pnand %p1236_p1, %p1196_p2  ;;  %p1245_p11 = por %p1244_p7, %p1243_p4 }
  0x39   : > { %p1239_p6 = pneg %p1238_p3 }
  0x3b   : > { %p1246_p13 = pnand %p1245_p11, %p1239_p6 }
  0x3d   : > { %1249 = shalt.err (!%p1246_p13)
}
  0x3e   : > { %s1358_s21 = smov 64   ;;  %s1359_s27 = smov 4  }
  0x3f   : > { %1093 = dma.hbm_to_vmem [thread:$0]  (!%p1455_p12), %s1670_s0, 512, %s206_s13, [#allocation4], %s1358_s21, %s1358_s21, %s1359_s27  }
  0x40   : > { %s232_s9 = sand.u32 1, %s1352_s24   ;;  %s234_s14 = sand.u32 1, %s1348_s23  }
  0x41   : > { %s982_s15 = sshll.u32 %s234_s14, 6  ;;  %s1015_s16 = sshll.u32 %s1352_s24, 10 }
  0x42   : > { %s1517_s19 = scalar_lea.hbm %s1671_s1, %s1015_s16  ;;  %s236_s11 = scalar_lea.vmem [#allocation6], %s982_s15 }
  0x43   : > { %s243_s20 = sshll.u32 %s236_s11, 4  ;;  %s1521_s10 = scalar_lea.sflag [#allocation7], %s232_s9  ;;  %s1519_s20 = int_to_ptr.vmem [resolvable:$true] %s243_s20 }
  0x44   : > { %s1250_s13 = scalar_lea.hbm %s1517_s19, 1024  ;;  %p1686_p2 = scmp.ne.s32.totalorder %s1685_s12, 0 }
  0x45   : > { %p1251_p12 = scmp.ne.s32.totalorder %s1517_s19, %s1250_s13  ;;  %s1255_s30 = scalar_lea.hbm %s1671_s1, 2048 }
  0x46   : > { %p1252_p5 = pneg %p1686_p2  ;;  %p1256_p10 = scmp.lt.u32.totalorder %s1517_s19, %s1671_s1 }
  0x47   : > { %p1257_p0 = scmp.lt.u32.totalorder %s1255_s30, %s1250_s13  ;;  %p1259_p3 = scmp.lt.u32.totalorder %s1250_s13, %s1517_s19 }
  0x48   : > { %p1253_p8 = pnand %p1252_p5, %p1251_p12 }
  0x49   : > { %p1258_p1 = por %p1257_p0, %p1256_p10 }
  0x4a   : > { %p1254_p9 = pneg %p1253_p8 }
  0x4b   : > { %p1260_p6 = por %p1259_p3, %p1258_p1 }
  0x4d   : > { %p1261_p4 = pnand %p1260_p6, %p1254_p9 }
  0x4f   : > { %1264 = shalt.err (!%p1261_p4)
}
  0x50   : > { %s1265_s9 = scalar_lea.vmem %s1519_s20, 1024  ;;  %s1360_s15 = smov [#allocation6]  }
  0x51   : > { %p1266_p7 = scmp.ne.s32.totalorder %s1519_s20, %s1265_s9  ;;  %s1270_s17 = sshll.u32 %s1360_s15, 4  ;;  %s1271_s17 = int_to_ptr.vmem [resolvable:$false] %s1270_s17 }
  0x52   : > { %s1272_s18 = scalar_lea.vmem %s1271_s17, 2048  ;;  %p1273_p12 = scmp.lt.s32.totalorder %s1519_s20, %s1271_s17 }
  0x53   : > { %p1268_p11 = pnand %p1266_p7, %p1252_p5  ;;  %p1274_p8 = scmp.lt.s32.totalorder %s1272_s18, %s1265_s9 }
  0x55   : > { %p1269_p13 = pneg %p1268_p11  ;;  %p1275_p10 = por %p1274_p8, %p1273_p12 }
  0x57   : > { %p1276_p0 = pnand %p1275_p10, %p1269_p13 }
  0x59   : > { %1279 = shalt.err (!%p1276_p0)
}
  0x5a   : > { %1100 = dma.hbm_to_vmem [thread:$0]  (!%p1686_p2), %s1517_s19, 1024, %s1519_s20, %s1521_s10, %s1358_s21, %s1358_s21, %s1359_s27  }
  0x5b   : > { %p1687_p5 = scmp.ne.s32.totalorder %s1683_s8, 0 }
  0x5c   : > { %p1688_p9 = scmp.eq.s32.totalorder (!%p1687_p5), %s1418_s25, 0 }
  0x5d   : > { %273 = sbr.rel (%p1687_p5) target bundleno = 1097 (0x449), region = 44 }
  0x64   : > { %1323 = dma.done.wait (%p1688_p9), [#allocation4], 512   ;;  %p1689_p1 = pmov %p1688_p9 }
  0x65   : > { %s279_s12 = sand.u32 1, %s1418_s25   ;;  %s281_s11 = sand.u32 1, %s1344_s22  }
  0x66   : > { %1325 = vsyncadd (%p1689_p1), [#allocation4], 4294966784  ;;  %s987_s13 = sshll.u32 %s281_s11, 6  ;;  %s280_s24 = scalar_lea.sflag [#allocation7], %s279_s12 }
  0x67   : > { %s1560_s28 = scalar_lea.vmem [#allocation6], %s987_s13  ;;  %p1690_p3 = scmp.ne.s32.totalorder %s1682_s7, 0 }
  0x69   : > { %1327 = dma.done.wait (%p1690_p3), %s280_s24, 1024  }
  0x6a   : > { %1329 = vsyncadd (%p1690_p3), %s280_s24, 4294966272  ;;  %p1691_p2 = pmov %p1689_p1 }
  0x6b   : > { %p1692_p6 = pmov %p1689_p1 }
  0x6c   : > { %1331 = dma.done.wait (%p1691_p2), [#allocation7], 1024  }
  0x6d   : > { %1333 = vsyncadd (%p1692_p6), [#allocation7], 4294966272  ;;  %p320_p4 = scmp.lt.s32.totalorder %s1418_s25, 1  ;;  %p1693_p7 = scmp.ne.s32.totalorder %s1418_s25, 0 }
  0x6e   : > { %v1150_v0 = vld [vmem:[#allocation3] sm:$0xff] (!%p1693_p7)   ;;  %v1151_v1 = vld [vmem:[#allocation3 + $0x8] sm:$0xff] (!%p1693_p7)   ;;  %v1152_v2 = vld [vmem:[#allocation3 + $0x10] sm:$0xff] (!%p1693_p7)  }
  0x6f   : > { %s1572_s8 = scalar_select %p320_p4, %s1418_s25, 1 }
  0x70   : > { %333 = sbr.rel (%p1693_p7) target bundleno = 119 (0x77), region = 60  ;;  %366 = vst [vmem:[#allocation2] sm:$0xff] (!%p1693_p7), %v1150_v0  ;;  %367 = vst [vmem:[#allocation2 + $0x8] sm:$0xff] (!%p1693_p7), %v1151_v1  ;;  %v1153_v3 = vld [vmem:[#allocation3 + $0x18] sm:$0xff] (!%p1693_p7)  }
  0x71   : > { %s322_s19 = scalar_lea.vmem %s1672_s2, %s1572_s8  ;;  %s325_s10 = scalar_lea.vmem %s1673_s3, %s1572_s8  ;;  %368 = vst [vmem:[#allocation2 + $0x10] sm:$0xff] (!%p1693_p7), %v1152_v2  ;;  %369 = vst [vmem:[#allocation2 + $0x18] sm:$0xff] (!%p1693_p7), %v1153_v3 }
  0x72   : > { %s328_s16 = scalar_lea.vmem %s1674_s4, %s1572_s8 }
  0x77 PF: > { %v1154_v4 = vld [vmem:[%s1560_s28] sm:$0xff]   ;;  %v1155_v5 = vld [vmem:[%s1560_s28 + $0x8] sm:$0xff]   ;;  %v1156_v6 = vld [vmem:[%s1560_s28 + $0x10] sm:$0xff]   ;;  %v597_v56 = vlaneseq  ;;  %vm641_vm0 = vcmask 523264   ;;  %p1009_p11 = scmp.eq.s32.totalorder %s1418_s25, 1 }
  0x78   : > { %1036 = vmatprep.subr.bf16.mxu0 %v1154_v4  ;;  %v1157_v7 = vld [vmem:[%s1560_s28 + $0x18] sm:$0xff]   ;;  %v370_v8 = vld [vmem:[#allocation2] sm:$0xff]  ;;  %v1159_v10 = vld [vmem:[%s1560_s28 + $0x28] sm:$0xff]  }
  0x79   : > { %1037 = vmatpush3.bf16.msra.mxu0 %v1154_v4  ;;  %1052 = vmatprep.mubr.bf16.mxu0 %v370_v8  ;;  %v1158_v9 = vld [vmem:[%s1560_s28 + $0x20] sm:$0xff]   ;;  %v1160_v11 = vld [vmem:[%s1560_s28 + $0x30] sm:$0xff]   ;;  %v1161_v12 = vld [vmem:[%s1560_s28 + $0x38] sm:$0xff]   ;;  %v598_v58 = vshrl.u32 %v597_v56, 7 }
  0x7a   : > { %1038 = vmatprep.subr.bf16.mxu0 %v1155_v5  ;;  %v371_v13 = vld [vmem:[#allocation2 + $0x8] sm:$0xff]  ;;  %v372_v14 = vld [vmem:[#allocation2 + $0x10] sm:$0xff]  ;;  %v373_v15 = vld [vmem:[#allocation2 + $0x18] sm:$0xff] }
  0x7b   : > { %v1003_v16 = vld [vmem:[%s322_s19] ss:$0 sm:$0xff]  ;;  %v599_v60 = vsub.s32 0, %v598_v58 }
  0x7c   : > { %v1002_v36 = vld [vmem:[%s325_s10] ss:$0 sm:$0xff] }
  0x7d   : > { %1039 = vmatpush3.bf16.msra.mxu0 %v1155_v5 }
  0x7e   : > { %1040 = vmatprep.subr.bf16.mxu0 %v1156_v6 }
  0x81   : > { %1041 = vmatpush3.bf16.msra.mxu0 %v1156_v6  ;;  %v625_v6 = vld [vmem:[#allocation8] sm:$0xff] }
  0x82   : > { %1042 = vmatprep.subr.bf16.mxu0 %v1157_v7 }
  0x85   : > { %1043 = vmatpush3.bf16.msra.mxu0 %v1157_v7 }
  0x86   : > { %1044 = vmatprep.subr.bf16.mxu0 %v1158_v9 }
  0x89   : > { %1045 = vmatpush3.bf16.msra.mxu0 %v1158_v9 }
  0x8a   : > { %1046 = vmatprep.subr.bf16.mxu0 %v1159_v10 }
  0x8d   : > { %1047 = vmatpush3.bf16.msra.mxu0 %v1159_v10 }
  0x8e   : > { %1048 = vmatprep.subr.bf16.mxu0 %v1160_v11 }
  0x91   : > { %1049 = vmatpush3.bf16.msra.mxu0 %v1160_v11  ;;  %v626_v11 = vld [vmem:[#allocation8 + $0x8] sm:$0xff] }
  0x92   : > { %1050 = vmatprep.subr.bf16.mxu0 %v1161_v12 }
  0x95   : > { %1051 = vmatpush3.bf16.msra.mxu0 %v1161_v12 }
  0x98   : > { %1053 = vmatmul.mubr.bf16.vlgmr.msra.gmra.mrb[0].mxu0 %v371_v13 }
  0x99   : > { %1056 = vmatprep.mubr.bf16.mxu0 %v372_v14 }
  0xa0   : > { %1057 = vmatmul.mubr.bf16.gmra.mrb[4].mxu0 %v373_v15 }
 0x16b   : > { %v1054_v17 = vpop.f32.mrb[0].mxu0 }
 0x16c   : > { %v472_v18 = vpop.f32.mrb[1].mxu0  ;;  %v543_v19 = vmul.f32 %v1054_v17, %v1003_v16  ;;  %v512_v40 = vmul.f32 %v1054_v17, %v1002_v36 }
 0x16d   : > { %v1055_v20 = vpop.f32.mrb[2].mxu0  ;;  %v541_v21 = vmul.f32 %v1003_v16, %v472_v18  ;;  %v510_v38 = vmul.f32 %v1002_v36, %v472_v18 }
 0x16e   : > { %v727_v22 = vpack.c.bf16 %v1055_v20, %v1054_v17  ;;  %553 = vadd.xlane.f32.xlu1 %v543_v19  ;;  %v475_v23 = vpop.f32.mrb[3].mxu0  ;;  %v544_v25 = vmul.f32 %v1055_v20, %v1003_v16  ;;  %v513_v41 = vmul.f32 %v1055_v20, %v1002_v36 }
 0x16f   : > { %549 = vadd.xlane.f32.xlu0 %v541_v21  ;;  %v726_v24 = vpack.c.bf16 %v475_v23, %v472_v18  ;;  %v542_v26 = vmul.f32 %v1003_v16, %v475_v23  ;;  %v511_v39 = vmul.f32 %v1002_v36, %v475_v23  ;;  %v627_v18 = vld [vmem:[#allocation8 + $0x10] sm:$0xff] }
 0x171   : > { %1060 = vmatprep.subr.bf16.mxu1 %v726_v24 }
 0x172   : > { %555 = vadd.xlane.f32.xlu1 %v544_v25  ;;  %1061 = vmatpush3.bf16.msra.mxu1 %v726_v24  ;;  %v628_v25 = vld [vmem:[#allocation8 + $0x18] sm:$0xff] }
 0x173   : > { %1062 = vmatprep.subr.bf16.mxu1 %v727_v22  ;;  %551 = vadd.xlane.f32.xlu0 %v542_v26  ;;  %v1058_v27 = vpop.f32.mrb[4].mxu0 }
 0x174   : > { %v488_v28 = vpop.f32.mrb[5].mxu0  ;;  %v547_v29 = vmul.f32 %v1058_v27, %v1003_v16  ;;  %v516_v44 = vmul.f32 %v1058_v27, %v1002_v36 }
 0x175   : > { %v1059_v30 = vpop.f32.mrb[6].mxu0  ;;  %v545_v35 = vmul.f32 %v1003_v16, %v488_v28  ;;  %v514_v42 = vmul.f32 %v1002_v36, %v488_v28 }
 0x176   : > { %v729_v31 = vpack.c.bf16 %v1059_v30, %v1058_v27  ;;  %v491_v32 = vpop.f32.mrb[7].mxu0  ;;  %1063 = vmatpush3.bf16.msra.mxu1 %v727_v22  ;;  %v548_v37 = vmul.f32 %v1059_v30, %v1003_v16  ;;  %v517_v45 = vmul.f32 %v1059_v30, %v1002_v36 }
 0x177   : > { %v728_v33 = vpack.c.bf16 %v491_v32, %v488_v28  ;;  %561 = vadd.xlane.f32.xlu0 %v547_v29  ;;  %v546_v34 = vmul.f32 %v1003_v16, %v491_v32  ;;  %v515_v43 = vmul.f32 %v1002_v36, %v491_v32 }
 0x179   : > { %1064 = vmatprep.subr.bf16.mxu1 %v728_v33  ;;  %559 = vadd.xlane.f32.xlu1 %v546_v34 }
 0x17a   : > { %1065 = vmatpush3.bf16.msra.mxu1 %v728_v33 }
 0x17b   : > { %557 = vadd.xlane.f32.xlu0 %v545_v35  ;;  %1066 = vmatprep.subr.bf16.mxu1 %v729_v31 }
 0x17d   : > { %563 = vadd.xlane.f32.xlu1 %v548_v37 }
 0x17e   : > { %1067 = vmatpush3.bf16.msra.mxu1 %v729_v31  ;;  %v629_v31 = vld [vmem:[#allocation8 + $0x20] sm:$0xff] }
 0x17f   : > { %518 = vadd.xlane.f32.xlu0 %v510_v38  ;;  %v630_v38 = vld [vmem:[#allocation8 + $0x28] sm:$0xff] }
 0x181   : > { %520 = vadd.xlane.f32.xlu1 %v511_v39 }
 0x183   : > { %522 = vadd.xlane.f32.xlu0 %v512_v40 }
 0x185   : > { %524 = vadd.xlane.f32.xlu1 %v513_v41 }
 0x187   : > { %526 = vadd.xlane.f32.xlu0 %v514_v42 }
 0x189   : > { %528 = vadd.xlane.f32.xlu1 %v515_v43  ;;  %v631_v43 = vld [vmem:[#allocation8 + $0x30] sm:$0xff] }
 0x18b   : > { %530 = vadd.xlane.f32.xlu0 %v516_v44 }
 0x18d   : > { %532 = vadd.xlane.f32.xlu1 %v517_v45 }
 0x1fb   : > { %v554_v48 = vpop.xlane.xlu1 %553 }
 0x1fc   : > { %v550_v46 = vpop.xlane.xlu0 %549 }
 0x1fd   : > { %565 = vxpose.xlu0.b32.start [1/8] (short) (narrow) %v550_v46, 8 }
 0x1ff   : > { %v556_v50 = vpop.xlane.xlu1 %555 }
 0x200   : > { %v552_v47 = vpop.xlane.xlu0 %551 }
 0x201   : > { %566 = vxpose.xlu0.b32.cont [2/8] (short) (narrow) %v552_v47, 8  ;;  %v632_v47 = vld [vmem:[#allocation8 + $0x38] sm:$0xff] }
 0x204   : > { %v562_v49 = vpop.xlane.xlu0 %561 }
 0x205   : > { %567 = vxpose.xlu0.b32.cont [3/8] (short) (narrow) %v554_v48, 8 }
 0x206   : > { %v560_v52 = vpop.xlane.xlu1 %559 }
 0x208   : > { %v558_v51 = vpop.xlane.xlu0 %557 }
 0x209   : > { %568 = vxpose.xlu0.b32.cont [4/8] (short) (narrow) %v556_v50, 8 }
 0x20a   : > { %v564_v53 = vpop.xlane.xlu1 %563 }
 0x20c   : > { %v519_v54 = vpop.xlane.xlu0 %518 }
 0x20d   : > { %569 = vxpose.xlu0.b32.cont [5/8] (short) (narrow) %v558_v51, 8 }
 0x20e   : > { %v521_v61 = vpop.xlane.xlu1 %520 }
 0x210   : > { %v523_v55 = vpop.xlane.xlu0 %522 }
 0x211   : > { %570 = vxpose.xlu0.b32.cont [6/8] (short) (narrow) %v560_v52, 8 }
 0x212   : > { %v525_v5 = vpop.xlane.xlu1 %524 }
 0x214   : > { %v527_v57 = vpop.xlane.xlu0 %526 }
 0x215   : > { %571 = vxpose.xlu0.b32.cont [7/8] (short) (narrow) %v562_v49, 8 }
 0x216   : > { %v529_v19 = vpop.xlane.xlu1 %528 }
 0x218   : > { %v531_v59 = vpop.xlane.xlu0 %530 }
 0x219   : > { %572 = vxpose.xlu0.b32.end [8/8] (short) (narrow) %v564_v53, 8 }
 0x21a   : > { %v533_v32 = vpop.xlane.xlu1 %532 }
 0x27d   : > { %v581_v62 = vpop.trf.xlu0 }
 0x27e   : > { %v600_v63 = vrot.slane %v581_v62, %v599_v60 }
 0x280   : > { %v601_v0 = vadd.f32 %v600_v63, %v519_v54  ;;  %v602_v1 = vadd.f32 %v600_v63, %v521_v61  ;;  %v603_v2 = vadd.f32 %v600_v63, %v523_v55  ;;  %v604_v10 = vadd.f32 %v600_v63, %v525_v5 }
 0x281   : > { %v605_v13 = vadd.f32 %v600_v63, %v527_v57  ;;  %v606_v20 = vadd.f32 %v600_v63, %v529_v19  ;;  %v607_v26 = vadd.f32 %v600_v63, %v531_v59  ;;  %v608_v33 = vadd.f32 %v600_v63, %v533_v32 }
 0x282   : > { %v609_v3 = vmul.f32 0.2, %v601_v0  ;;  %v610_v4 = vmul.f32 0.2, %v602_v1  ;;  %v611_v9 = vmul.f32 0.2, %v603_v2 }
 0x283   : > { %v612_v17 = vmul.f32 0.2, %v604_v10  ;;  %v613_v24 = vmul.f32 0.2, %v605_v13  ;;  %v614_v30 = vmul.f32 0.2, %v606_v20 }
 0x284   : > { %v617_v7 = vmax.f32 %v601_v0, %v609_v3  ;;  %v618_v8 = vmax.f32 %v602_v1, %v610_v4  ;;  %v619_v16 = vmax.f32 %v603_v2, %v611_v9  ;;  %v615_v37 = vmul.f32 0.2, %v607_v26 }
 0x285   : > { %v620_v23 = vmax.f32 %v604_v10, %v612_v17  ;;  %v621_v29 = vmax.f32 %v605_v13, %v613_v24  ;;  %v622_v36 = vmax.f32 %v606_v20, %v614_v30  ;;  %v616_v42 = vmul.f32 0.2, %v608_v33 }
 0x286   : > { %v633_v12 = vadd.f32 %v625_v6, %v617_v7  ;;  %v634_v15 = vadd.f32 %v626_v11, %v618_v8  ;;  %v635_v22 = vadd.f32 %v627_v18, %v619_v16  ;;  %v623_v41 = vmax.f32 %v607_v26, %v615_v37 }
 0x287   : > { %v636_v28 = vadd.f32 %v628_v25, %v620_v23  ;;  %v637_v35 = vadd.f32 %v629_v31, %v621_v29  ;;  %v638_v40 = vadd.f32 %v630_v38, %v622_v36  ;;  %v624_v46 = vmax.f32 %v608_v33, %v616_v42 }
 0x288   : > { %v642_v14 = vsel %vm641_vm0, %v633_v12, -inf  ;;  %v645_v21 = vsel %vm641_vm0, %v634_v15, -inf  ;;  %v648_v27 = vsel %vm641_vm0, %v635_v22, -inf  ;;  %v639_v45 = vadd.f32 %v631_v43, %v623_v41 }
 0x289   : > { %643 = vmax.xlane.f32.xlu1 %v642_v14  ;;  %v651_v34 = vsel %vm641_vm0, %v636_v28, -inf  ;;  %v654_v39 = vsel %vm641_vm0, %v637_v35, -inf  ;;  %v657_v44 = vsel %vm641_vm0, %v638_v40, -inf  ;;  %v640_v49 = vadd.f32 %v632_v47, %v624_v46 }
 0x28a   : > { %v660_v48 = vsel %vm641_vm0, %v639_v45, -inf }
 0x28b   : > { %v663_v50 = vsel %vm641_vm0, %v640_v49, -inf }
 0x28d   : > { %646 = vmax.xlane.f32.xlu1 %v645_v21 }
 0x291   : > { %649 = vmax.xlane.f32.xlu1 %v648_v27 }
 0x295   : > { %652 = vmax.xlane.f32.xlu1 %v651_v34 }
 0x299   : > { %655 = vmax.xlane.f32.xlu1 %v654_v39 }
 0x29d   : > { %658 = vmax.xlane.f32.xlu1 %v657_v44 }
 0x2a1   : > { %661 = vmax.xlane.f32.xlu1 %v660_v48 }
 0x2a5   : > { %664 = vmax.xlane.f32.xlu1 %v663_v50 }
 0x316   : > { %v644_v51 = vpop.xlane.xlu1 %643 }
 0x317   : > { %v666_v52 = vsub.f32 %v633_v12, %v644_v51 }
 0x319   : > { %v674_v53 = vmul.f32 1.442695, %v666_v52 }
 0x31a   : > { %v647_v54 = vpop.xlane.xlu1 %646 }
 0x31b   : > { %1162 = vpow2.f32 %v674_v53  ;;  %v667_v55 = vsub.f32 %v634_v15, %v647_v54 }
 0x31d   : > { %v676_v56 = vmul.f32 1.442695, %v667_v55 }
 0x31e   : > { %v650_v57 = vpop.xlane.xlu1 %649 }
 0x31f   : > { %1164 = vpow2.f32 %v676_v56  ;;  %v668_v58 = vsub.f32 %v635_v22, %v650_v57 }
 0x321   : > { %v678_v59 = vmul.f32 1.442695, %v668_v58 }
 0x322   : > { %v653_v60 = vpop.xlane.xlu1 %652 }
 0x323   : > { %1166 = vpow2.f32 %v678_v59  ;;  %v669_v61 = vsub.f32 %v636_v28, %v653_v60 }
 0x325   : > { %v1163_v62 = vpop.eup %1162  ;;  %v680_v63 = vmul.f32 1.442695, %v669_v61 }
 0x326   : > { %v656_v0 = vpop.xlane.xlu1 %655  ;;  %v690_v1 = vsel %vm641_vm0, %v1163_v62, 0.0 }
 0x327   : > { %1168 = vpow2.f32 %v680_v63  ;;  %v670_v2 = vsub.f32 %v637_v35, %v656_v0  ;;  %691 = vadd.xlane.f32.xlu1 %v690_v1 }
 0x329   : > { %v1165_v3 = vpop.eup %1164  ;;  %v682_v4 = vmul.f32 1.442695, %v670_v2 }
 0x32a   : > { %v659_v5 = vpop.xlane.xlu1 %658  ;;  %v693_v6 = vsel %vm641_vm0, %v1165_v3, 0.0  ;;  %v722_v7 = vpack.c.bf16 %v1165_v3, %v1163_v62 }
 0x32b   : > { %1170 = vpow2.f32 %v682_v4  ;;  %v671_v8 = vsub.f32 %v638_v40, %v659_v5  ;;  %694 = vadd.xlane.f32.xlu1 %v693_v6  ;;  %v1008_v40 = vld [vmem:[%s328_s16] ss:$0 sm:$0xff] }
 0x32c   : > { %1068 = vmatprep.mubr.msk.bf16.mxu1 %vm641_vm0, %v722_v7 }
 0x32d   : > { %v1167_v9 = vpop.eup %1166  ;;  %v684_v10 = vmul.f32 1.442695, %v671_v8 }
 0x32e   : > { %v662_v11 = vpop.xlane.xlu1 %661  ;;  %v696_v12 = vsel %vm641_vm0, %v1167_v9, 0.0 }
 0x32f   : > { %1172 = vpow2.f32 %v684_v10  ;;  %v672_v13 = vsub.f32 %v639_v45, %v662_v11  ;;  %697 = vadd.xlane.f32.xlu1 %v696_v12 }
 0x331   : > { %v1169_v14 = vpop.eup %1168  ;;  %v686_v15 = vmul.f32 1.442695, %v672_v13 }
 0x332   : > { %v665_v16 = vpop.xlane.xlu1 %664  ;;  %v699_v17 = vsel %vm641_vm0, %v1169_v14, 0.0  ;;  %v723_v18 = vpack.c.bf16 %v1169_v14, %v1167_v9 }
 0x333   : > { %1174 = vpow2.f32 %v686_v15  ;;  %v673_v19 = vsub.f32 %v640_v49, %v665_v16  ;;  %700 = vadd.xlane.f32.xlu1 %v699_v17 }
 0x334   : > { %1069 = vmatmul.mubr.msk.bf16.vlgmr.msra.gmra.mrb[0].mxu1 %vm641_vm0, %v723_v18 }
 0x335   : > { %v1171_v20 = vpop.eup %1170  ;;  %v688_v21 = vmul.f32 1.442695, %v673_v19 }
 0x336   : > { %v702_v22 = vsel %vm641_vm0, %v1171_v20, 0.0 }
 0x337   : > { %1176 = vpow2.f32 %v688_v21  ;;  %703 = vadd.xlane.f32.xlu1 %v702_v22 }
 0x339   : > { %v1173_v23 = vpop.eup %1172 }
 0x33a   : > { %v705_v24 = vsel %vm641_vm0, %v1173_v23, 0.0  ;;  %v724_v25 = vpack.c.bf16 %v1173_v23, %v1171_v20 }
 0x33b   : > { %706 = vadd.xlane.f32.xlu1 %v705_v24 }
 0x33c   : > { %1072 = vmatprep.mubr.msk.bf16.mxu1 %vm641_vm0, %v724_v25 }
 0x33d   : > { %v1175_v26 = vpop.eup %1174 }
 0x33e   : > { %v708_v27 = vsel %vm641_vm0, %v1175_v26, 0.0 }
 0x33f   : > { %709 = vadd.xlane.f32.xlu1 %v708_v27 }
 0x341   : > { %v1177_v28 = vpop.eup %1176 }
 0x342   : > { %v711_v29 = vsel %vm641_vm0, %v1177_v28, 0.0  ;;  %v725_v30 = vpack.c.bf16 %v1177_v28, %v1175_v26 }
 0x343   : > { %712 = vadd.xlane.f32.xlu1 %v711_v29 }
 0x344   : > { %1073 = vmatmul.mubr.msk.bf16.gmra.mrb[4].mxu1 %vm641_vm0, %v725_v30 }
 0x3b4   : > { %v692_v31 = vpop.xlane.xlu1 %691 }
 0x3b8   : > { %v695_v32 = vpop.xlane.xlu1 %694 }
 0x3bc   : > { %v698_v33 = vpop.xlane.xlu1 %697 }
 0x3bd   : > { %1178 = vrcp.f32 %v698_v33 }
 0x3be   : > { %1180 = vrcp.f32 %v692_v31 }
 0x3c0   : > { %v701_v34 = vpop.xlane.xlu1 %700 }
 0x3c1   : > { %1182 = vrcp.f32 %v701_v34 }
 0x3c2   : > { %1184 = vrcp.f32 %v695_v32 }
 0x3c4   : > { %v704_v35 = vpop.xlane.xlu1 %703 }
 0x3c7   : > { %v1179_v38 = vpop.eup %1178 }
 0x3c8   : > { %v707_v36 = vpop.xlane.xlu1 %706  ;;  %v1181_v41 = vpop.eup %1180 }
 0x3cb   : > { %v1183_v44 = vpop.eup %1182 }
 0x3cc   : > { %v710_v37 = vpop.xlane.xlu1 %709  ;;  %v1185_v47 = vpop.eup %1184 }
 0x3cd   : > { %1186 = vrcp.f32 %v710_v37 }
 0x3ce   : > { %1188 = vrcp.f32 %v704_v35 }
 0x3d0   : > { %v713_v53 = vpop.xlane.xlu1 %712 }
 0x3d1   : > { %1190 = vrcp.f32 %v713_v53 }
 0x3d2   : > { %1192 = vrcp.f32 %v707_v36 }
 0x3d7   : > { %v1187_v56 = vpop.eup %1186 }
 0x3d8   : > { %v1189_v58 = vpop.eup %1188 }
 0x3db   : > { %v1191_v61 = vpop.eup %1190 }
 0x3dc   : > { %v1193_v0 = vpop.eup %1192 }
 0x407   : > { %v1070_v39 = vpop.f32.mrb[0].mxu1 }
 0x408   : > { %v809_v42 = vmul.f32 %v1179_v38, %v1070_v39  ;;  %v776_v43 = vpop.f32.mrb[1].mxu1 }
 0x409   : > { %v807_v45 = vmul.f32 %v1181_v41, %v776_v43  ;;  %v1071_v46 = vpop.f32.mrb[2].mxu1 }
 0x40a   : > { %v824_v48 = vadd.f32 %v1008_v40, %v809_v42  ;;  %v810_v49 = vmul.f32 %v1183_v44, %v1071_v46  ;;  %v779_v50 = vpop.f32.mrb[3].mxu1 }
 0x40b   : > { %v822_v51 = vadd.f32 %v1008_v40, %v807_v45  ;;  %v808_v52 = vmul.f32 %v1185_v47, %v779_v50 }
 0x40c   : > { %v825_v54 = vadd.f32 %v1008_v40, %v810_v49  ;;  %v836_v10 = vmul.f32 (!%p1009_p11), 0.01, %v824_v48 }
 0x40d   : > { %v823_v55 = vadd.f32 %v1008_v40, %v808_v52  ;;  %v834_v8 = vmul.f32 (!%p1009_p11), 0.01, %v822_v51 }
 0x40e   : > { %v837_v11 = vmul.f32 (!%p1009_p11), 0.01, %v825_v54  ;;  %v844_v16 = vmax.f32 (!%p1009_p11), %v824_v48, %v836_v10 }
 0x40f   : > { %v835_v9 = vmul.f32 (!%p1009_p11), 0.01, %v823_v55  ;;  %v842_v14 = vmax.f32 (!%p1009_p11), %v822_v51, %v834_v8 }
 0x410   : > { %v845_v18 = vmax.f32 (!%p1009_p11), %v825_v54, %v837_v11 }
 0x411   : > { %v843_v15 = vmax.f32 (!%p1009_p11), %v823_v55, %v835_v9 }
 0x412   : > { %v851_v24 = vpack.c.bf16 (!%p1009_p11), %v845_v18, %v844_v16 }
 0x413   : > { %v850_v22 = vpack.c.bf16 (!%p1009_p11), %v843_v15, %v842_v14 }
 0x414   : > { %855 = vst [vmem:[#allocation2 + $0x8] sm:$0xff] (!%p1009_p11), %v851_v24 }
 0x415   : > { %854 = vst [vmem:[#allocation2] sm:$0xff] (!%p1009_p11), %v850_v22 }
 0x417   : > { %v1074_v57 = vpop.f32.mrb[4].mxu1  ;;  %833 = sbr.rel (%p1009_p11) target bundleno = 1062 (0x426), region = 64 }
 0x418   : > { %v813_v59 = vmul.f32 %v1187_v56, %v1074_v57  ;;  %v792_v60 = vpop.f32.mrb[5].mxu1 }
 0x419   : > { %v811_v62 = vmul.f32 %v1189_v58, %v792_v60  ;;  %v1075_v63 = vpop.f32.mrb[6].mxu1 }
 0x41a   : > { %v828_v1 = vadd.f32 %v1008_v40, %v813_v59  ;;  %v814_v2 = vmul.f32 %v1191_v61, %v1075_v63  ;;  %v795_v3 = vpop.f32.mrb[7].mxu1 }
 0x41b   : > { %v826_v4 = vadd.f32 %v1008_v40, %v811_v62  ;;  %v812_v5 = vmul.f32 %v1193_v0, %v795_v3 }
 0x41c   : > { %v829_v6 = vadd.f32 %v1008_v40, %v814_v2  ;;  %v840_v17 = vmul.f32 (!%p1009_p11), 0.01, %v828_v1 }
 0x41d   : > { %v827_v7 = vadd.f32 %v1008_v40, %v812_v5  ;;  %v838_v12 = vmul.f32 (!%p1009_p11), 0.01, %v826_v4 }
 0x41e   : > { %v841_v21 = vmul.f32 0.01, %v829_v6  ;;  %v848_v23 = vmax.f32 %v828_v1, %v840_v17 }
 0x41f   : > { %v839_v13 = vmul.f32 0.01, %v827_v7  ;;  %v846_v19 = vmax.f32 %v826_v4, %v838_v12 }
 0x420   : > { %v849_v26 = vmax.f32 %v829_v6, %v841_v21 }
 0x421   : > { %v847_v20 = vmax.f32 %v827_v7, %v839_v13 }
 0x422   : > { %v853_v27 = vpack.c.bf16 %v849_v26, %v848_v23 }
 0x423   : > { %v852_v25 = vpack.c.bf16 %v847_v20, %v846_v19 }
 0x424   : > { %857 = vst [vmem:[#allocation2 + $0x18] sm:$0xff] %v853_v27 }
 0x425   : > { %856 = vst [vmem:[#allocation2 + $0x10] sm:$0xff] %v852_v25 }
 0x426 PF: > { %p1010_p13 = scmp.ne.s32.totalorder %s1418_s25, 1 }
 0x427   : > { %862 = vst [vmem:[#allocation9] sm:$0xff] (!%p1010_p13), %v822_v51  ;;  %863 = vst [vmem:[#allocation9 + $0x8] sm:$0xff] (!%p1010_p13), %v823_v55 }
 0x428   : > { %861 = sbr.rel (%p1010_p13) target bundleno = 1071 (0x42f), region = 68  ;;  %864 = vst [vmem:[#allocation9 + $0x10] sm:$0xff] (!%p1010_p13), %v824_v48  ;;  %865 = vst [vmem:[#allocation9 + $0x18] sm:$0xff] (!%p1010_p13), %v825_v54 }
 0x429   : > { %866 = vst [vmem:[#allocation9 + $0x20] sm:$0xff] (!%p1010_p13), %v826_v4  ;;  %867 = vst [vmem:[#allocation9 + $0x28] sm:$0xff] (!%p1010_p13), %v827_v7 }
 0x42a   : > { %868 = vst [vmem:[#allocation9 + $0x30] sm:$0xff] (!%p1010_p13), %v828_v1  ;;  %869 = vst [vmem:[#allocation9 + $0x38] sm:$0xff] (!%p1010_p13), %v829_v6 }
 0x42f PF: > { %s1361_s13 = smov [#allocation9]  }
 0x430   : > { %s876_s24 = sshll.u32 %s1361_s13, 4  ;;  %s877_s24 = int_to_ptr.vmem [resolvable:$true] %s876_s24 }
 0x431   : > { %s1280_s28 = scalar_lea.vmem %s877_s24, 1024  ;;  %p1287_p0 = scmp.lt.s32.totalorder %s877_s24, %s877_s24 }
 0x432   : > { %p1281_p12 = scmp.ne.s32.totalorder %s877_s24, %s1280_s28  ;;  %p1288_p5 = scmp.lt.s32.totalorder %s1280_s28, %s1280_s28 }
 0x434   : > { %p1282_p8 = pnand %p1281_p12, %p1009_p11  ;;  %p1289_p9 = por %p1288_p5, %p1287_p0 }
 0x436   : > { %p1283_p10 = pneg %p1282_p8 }
 0x438   : > { %p1290_p1 = pnand %p1289_p9, %p1283_p10 }
 0x43a   : > { %1293 = shalt.err (!%p1290_p1)
}
 0x43b   : > { %s1294_s27 = scalar_lea.hbm %s1676_s6, 1024 }
 0x43c   : > { %p1295_p3 = scmp.ne.s32.totalorder %s1676_s6, %s1294_s27  ;;  %p1300_p4 = scmp.lt.u32.totalorder %s1294_s27, %s1676_s6 }
 0x43e   : > { %p1296_p2 = pnand %p1295_p3, %p1009_p11 }
 0x440   : > { %p1297_p6 = pneg %p1296_p2 }
 0x442   : > { %p1302_p7 = pnand %p1300_p4, %p1297_p6 }
 0x444   : > { %1305 = shalt.err (!%p1302_p7)
}
 0x445   : > { %s1362_s30 = smov 128   ;;  %s1363_s14 = smov 8  }
 0x446   : > { %1087 = dma.vmem_to_hbm [thread:$0]  (%p1009_p11), %s877_s24, 1024, %s1676_s6, [#allocation5], %s1362_s30, %s1362_s30, %s1363_s14  }
 0x447   : > { %1335 = dma.done.wait (%p1009_p11), [#allocation5], 1024  }
 0x448   : > { %1337 = vsyncadd (%p1009_p11), [#allocation5], 4294966272 }
 0x449 PF: > { %p18_p13 = scmp.ge.s32.totalorder %s1421_s26, 4   ;;  %s1694_s21 = smov %s1344_s22 }
 0x44a   : > { %s1695_s22 = smov %s1348_s23  ;;  %s1696_s23 = smov %s1431_s29 }
 0x44b   : > { %s1697_s24 = smov %s1421_s26  ;;  %20 = sbr.rel (!%p18_p13) target bundleno = 5 (0x5), region = 111 }
 0x452   :  { %892 = vsyncpa [#allocation4], 1 }
 0x453   :  { %894 = vsyncpa [#allocation4 + $0x1], 1 }
 0x454   :  { %895 = vsyncpa [#allocation7], 1 }
 0x455   :  { %897 = vsyncpa [#allocation7 + $0x1], 1 }
 0x456   :  { %898 = vsyncpa [#allocation5], 1 }
 0x457   :  { %900 = vsyncpa [#allocation5 + $0x1], 1 }

</bundles_post_ra>
